<compile_context>
chip_gen: v7x
topology: tpu7x:2x2x1
jax: 0.10.0
libtpu: 0.0.40
codegen_flags: <defaults>
</compile_context>

<pallas_src>
import jax
import jax.numpy as jnp
from jax.experimental import pallas as pl
from jax.experimental.pallas import tpu as pltpu


_LANE_CANDIDATES = (4096, 2048, 1024, 512, 256, 128)  # lane-dense last dim
_TILE_BYTES = 6 << 20          # ~6 MiB per VMEM buffer (2 in + 2 out = 24 MiB live)
_VMEM_LIMIT_BYTES = 48 << 20   # > v5e 16 MiB scoped default, < 64 MiB v7x physical
_SUBLANE_BY_ITEMSIZE = {4: 8, 2: 16, 1: 32}


def _scale_kernel(scale_ref, x_ref, o_ref):
    # scale_ref: SMEM (1,) f32; x_ref/o_ref: VMEM (tile_rows, lane_width).
    # Hoisted scalar cast + a single broadcast multiply in the input dtype.
    s = scale_ref[0].astype(x_ref.dtype)
    o_ref[...] = x_ref[...] * s


def _round_up(a: int, m: int) -> int:
    return ((a + m - 1) // m) * m


def _launch(scale, x2d, tile_rows: int, lane_width: int):
    rows = x2d.shape[0]
    grid = (pl.cdiv(rows, tile_rows),)
    return pl.pallas_call(
        _scale_kernel,
        out_shape=jax.ShapeDtypeStruct(x2d.shape, x2d.dtype),
        grid=grid,
        in_specs=[
            pl.BlockSpec(memory_space=pltpu.MemorySpace.SMEM),            # scale
            pl.BlockSpec((tile_rows, lane_width), lambda r: (r, 0)),      # x tile
        ],
        out_specs=pl.BlockSpec((tile_rows, lane_width), lambda r: (r, 0)),
        compiler_params=pltpu.CompilerParams(
            dimension_semantics=("parallel",),      # shard row tiles across TCs
            vmem_limit_bytes=_VMEM_LIMIT_BYTES,
        ),
    )(scale, x2d)


def random_scale_1d(x: jax.Array, key: jax.Array) -> jax.Array:
    """Multiply x (any shape, e.g. (B, C, L)) by a scalar drawn from N(0, 1)."""
    orig_shape = x.shape
    orig_dtype = x.dtype
    n = x.size

    # Random scalar (shape (1,), like torch.randn(1)). Glue, not the hot path.
    scale = jax.random.normal(key, (1,), dtype=jnp.float32)

    itemsize = jnp.dtype(orig_dtype).itemsize
    sublane = _SUBLANE_BY_ITEMSIZE.get(itemsize, 8)

    # ---- Lane-dense 2D view: (rows, lane_width), reshape-only when possible.
    lane_width = next((lw for lw in _LANE_CANDIDATES if n % lw == 0), None)
    x_flat = x.reshape(-1)

    if lane_width is None:
        # Rare irregular-size path: pad to the next lane multiple (costs one
        # extra HBM pass + trim).  All 128-multiple sizes take the free path.
        lane_width = 128
        rows = pl.cdiv(n, lane_width)
        x_flat = jnp.pad(x_flat, (0, rows * lane_width - n))
        trim = True
    else:
        rows = n // lane_width
        trim = False

    x2d = x_flat.reshape(rows, lane_width)

    # ---- Dtype-aware row tiling (edge block is masked, never padded). ----
    max_rows = max(
        sublane, (_TILE_BYTES // (lane_width * itemsize)) // sublane * sublane
    )
    if rows <= sublane:
        tile_rows = rows          # full-dim block (legal: equals array dim)
    elif rows <= max_rows:
        # Split into >=2 sublane-aligned tiles so both v7x TensorCores get work.
        tile_rows = max(sublane, _round_up(pl.cdiv(rows, 2), sublane))
    else:
        tile_rows = max_rows

    out2d = _launch(scale, x2d, tile_rows, lane_width)

    out_flat = out2d.reshape(-1)
    if trim:
        out_flat = out_flat[:n]
    return out_flat.reshape(orig_shape)


if __name__ == "__main__":
    key = jax.random.PRNGKey(0)
    k_x, k_scale = jax.random.split(key)

    # Small 1D-signal shape: batch=2, channels=4, length=128.
    x = jax.random.normal(k_x, (2, 4, 128), dtype=jnp.float32)

    out = random_scale_1d(x, k_scale)
    out = jax.block_until_ready(out)

    # Reference check against plain JAX (same PRNG key -> same scalar).
    scale_ref = jax.random.normal(k_scale, (1,), dtype=jnp.float32)
    expected = scale_ref * x
    assert out.shape == x.shape and out.dtype == x.dtype
    assert jnp.allclose(out, expected, atol=1e-6, rtol=1e-6)

    print("KERNEL_OK")
</pallas_src>

<mosaic_0001>
module attributes {stable_mosaic.version = 11 : i64} {
  func.func @_scale_kernel(%arg0: i32, %arg1: memref<1xf32, #tpu.memory_space<smem>>, %arg2: memref<1x1024xf32, #tpu.memory_space<vmem>>, %arg3: memref<1x1024xf32, #tpu.memory_space<vmem>>) attributes {dimension_semantics = [#tpu.dimension_semantics<parallel>], iteration_bounds = array<i64: 1>, scalar_prefetch = 0 : i64, scratch_operands = 0 : i64, tpu.core_type = #tpu.core_type<tc>, window_params = [{transform_indices = @transform_0, window_bounds = array<i64: 1>}, {transform_indices = @transform_1, window_bounds = array<i64: 1, 1024>}, {transform_indices = @transform_2, window_bounds = array<i64: 1, 1024>}]} {
    %c0 = arith.constant 0 : index
    %0 = memref.load %arg1[%c0] : memref<1xf32, #tpu.memory_space<smem>>
    %c0_0 = arith.constant 0 : index
    %c0_1 = arith.constant 0 : index
    %1 = vector.load %arg2[%c0_0, %c0_1] : memref<1x1024xf32, #tpu.memory_space<vmem>>, vector<1x1024xf32>
    %2 = vector.broadcast %0 : f32 to vector<1x1024xf32>
    %3 = arith.mulf %1, %2 : vector<1x1024xf32>
    %c0_2 = arith.constant 0 : index
    %c0_3 = arith.constant 0 : index
    %4 = vector.load %arg3[%c0_2, %c0_3] : memref<1x1024xf32, #tpu.memory_space<vmem>>, vector<1x1024xf32>
    tpu.vector_store %arg3[%c0_2, %c0_3], %3 {strides = array<i32>} : memref<1x1024xf32, #tpu.memory_space<vmem>>, vector<1x1024xf32>,
    return
  }
  func.func @transform_0(%arg0: i32) -> i32 {
    %c0_i32 = arith.constant 0 : i32
    %c0_i32_0 = arith.constant 0 : i32
    return %c0_i32 : i32
  }
  func.func @transform_1(%arg0: i32) -> (i32, i32) {
    %c0_i32 = arith.constant 0 : i32
    %c0_i32_0 = arith.constant 0 : i32
    return %arg0, %c0_i32 : i32, i32
  }
  func.func @transform_2(%arg0: i32) -> (i32, i32) {
    %c0_i32 = arith.constant 0 : i32
    %c0_i32_0 = arith.constant 0 : i32
    return %arg0, %c0_i32 : i32, i32
  }
}

</mosaic_0001>

<bundles_post_ra>
// kernel: tpu_custom_call.1
= control target key start
LH: loop header
LB: loop body
LE: loop exit
PB: predicated region body
PF: predicated region fallthrough
CT: control target
= control target key end

     0   :  { %8 = vsyncpa [#allocation4], 0  ;;  %s139_s0 = inlined_call_operand.<no memory space> [shape: f32[1], index: 0, kind: input, shape index: {}]   ;;  %s140_s1 = inlined_call_operand.hbm [shape: f32[1,1024], index: 1, kind: input, shape index: {}]   ;;  %s141_s2 = inlined_call_operand.hbm [shape: f32[1,1024], index: 2, kind: output, shape index: {}]  }
   0x1   :  { %9 = vsyncpa [#allocation5], 0  ;;  %s95_s9 = smov [#allocation3]   ;;  %s47_s13 = scalar_lea.hbm %s140_s1, 128 }
   0x2   :  { %s18_s10 = sshll.u32 %s95_s9, 4  ;;  %p48_p0 = scmp.ne.s32.totalorder %s140_s1, %s47_s13  ;;  %s19_s10 = int_to_ptr.vmem [resolvable:$true] %s18_s10 }
   0x3   :  { %p51_p1 = scmp.lt.u32.totalorder %s47_s13, %s140_s1 }
   0x5   :  { %p53_p2 = pnand %p51_p1, %p48_p0 }
   0x7   :  { %56 = shalt.err (!%p53_p2)
}
   0x8   :  { %s57_s18 = scalar_lea.vmem %s19_s10, 128  ;;  %p62_p4 = scmp.lt.s32.totalorder %s19_s10, %s19_s10 }
   0x9   :  { %p58_p3 = scmp.ne.s32.totalorder %s19_s10, %s57_s18  ;;  %p63_p5 = scmp.lt.s32.totalorder %s57_s18, %s57_s18 }
   0xb   :  { %p64_p6 = por %p63_p5, %p62_p4 }
   0xd   :  { %p65_p7 = pnand %p64_p6, %p58_p3 }
   0xf   :  { %68 = shalt.err (!%p65_p7)
}
  0x10   :  { %21 = dma.hbm_to_vmem [thread:$0]  %s140_s1, 128, %s19_s10, [#allocation4]  }
  0x11   :  { %91 = dma.done.wait [#allocation4], 128  }
  0x12   :  { %92 = vsyncadd [#allocation4], 4294967168  ;;  %v27_v0 = vstv %s139_s0  ;;  %s96_s23 = smov [#allocation6]   ;;  %v26_v1 = vld [vmem:[#allocation3] sm:$0xff] }
  0x13   :  { %s36_s24 = sshll.u32 %s96_s23, 4  ;;  %v28_v2 = vmul.f32 %v27_v0, %v26_v1  ;;  %s37_s24 = int_to_ptr.vmem [resolvable:$true] %s36_s24 }
  0x14   :  { %s69_s25 = scalar_lea.vmem %s37_s24, 128  ;;  %p74_p9 = scmp.lt.s32.totalorder %s37_s24, %s37_s24 }
  0x15   :  { %29 = vst [vmem:[#allocation6] sm:$0xff] %v28_v2  ;;  %p70_p8 = scmp.ne.s32.totalorder %s37_s24, %s69_s25  ;;  %p75_p10 = scmp.lt.s32.totalorder %s69_s25, %s69_s25 }
  0x17   :  { %p76_p11 = por %p75_p10, %p74_p9 }
  0x19   :  { %p77_p12 = pnand %p76_p11, %p70_p8 }
  0x1b   :  { %80 = shalt.err (!%p77_p12)
}
  0x1c   :  { %s81_s27 = scalar_lea.hbm %s141_s2, 128 }
  0x1d   :  { %p82_p13 = scmp.ne.s32.totalorder %s141_s2, %s81_s27  ;;  %p85_p0 = scmp.lt.u32.totalorder %s81_s27, %s141_s2 }
  0x1f   :  { %p87_p1 = pnand %p85_p0, %p82_p13 }
  0x21   :  { %90 = shalt.err (!%p87_p1)
}
  0x22   :  { %39 = dma.vmem_to_hbm [thread:$0]  %s37_s24, 128, %s141_s2, [#allocation5]  }
  0x23   :  { %93 = dma.done.wait [#allocation5], 128  }
  0x24   :  { %94 = vsyncadd [#allocation5], 4294967168 }
  0x25   :  { %43 = vsyncpa [#allocation4], 1 }
  0x26   :  { %44 = vsyncpa [#allocation5], 1 }

</bundles_post_ra>
